<compile_context>
chip_gen: v7x
topology: tpu7x:2x2x1
jax: 0.10.0
libtpu: 0.0.40
codegen_flags: <defaults>
</compile_context>

<pallas_src>
from functools import partial

import jax
import jax.numpy as jnp
from jax.experimental import pallas as pl
from jax.experimental.pallas import tpu as pltpu


def _round_up(x, m):
    return (x + m - 1) // m * m


def _splitmix32(x):
    """Stateless 32-bit finalizer hash (splitmix32). x: uint32 array."""
    x = x ^ (x >> 16)
    x = x * jnp.uint32(0x7FEB352D)
    x = x ^ (x >> 15)
    x = x * jnp.uint32(0x846CA68B)
    x = x ^ (x >> 16)
    return x


def _mask_bits(row_u32, col_u32, seed_u32):
    """Deterministic random bits per weight element.

    Depends only on (seed, global element index) -- independent of tiling/padding --
    so WeightDrop's "one mask for the whole weight per forward" semantics hold even
    when a weight tile is revisited by the grid.
    """
    h = (row_u32 * jnp.uint32(0x9E3779B1)) ^ (col_u32 * jnp.uint32(0x85EBCA77)) ^ seed_u32
    return _splitmix32(h)


def _weightdrop_linear_kernel(seed_ref, x_ref, w_ref, b_ref, o_ref, acc_ref,
                              *, p, training, tk, tn):
    """seed in SMEM (scalar prefetch); x (B,tk), w (tk,tn) slice of W^T,
    b (1,tn), o (B,tn) in VMEM; acc (B,tn) f32 scratch."""
    n = pl.program_id(0)
    k = pl.program_id(1)
    n_k = pl.num_programs(1)

    @pl.when(k == 0)
    def _init():
        acc_ref[...] = jnp.zeros_like(acc_ref)

    w = w_ref[...]
    if training and p > 0.0:
        # WeightDrop: dropout applied to the weight tensor itself.
        # keep iff bits >= p * 2^32  (keep prob = 1 - p); pure integer threshold
        # compare -- no shift / int->f32 convert / scale per weight element.
        seed = seed_ref[0].astype(jnp.uint32)
        row = (jax.lax.broadcasted_iota(jnp.int32, w.shape, 0) + k * tk).astype(jnp.uint32)
        col = (jax.lax.broadcasted_iota(jnp.int32, w.shape, 1) + n * tn).astype(jnp.uint32)
        bits = _mask_bits(row, col, seed)
        thresh = jnp.uint32(min(int(p * 4294967296.0), 4294967295))
        w = jnp.where(bits >= thresh, w, jnp.zeros_like(w))
        # 1/(1-p) is hoisted onto the (B, tn) accumulator at finalize (far fewer
        # elements than the (tk, tn) weight tile).

    # Native (M,K)x(K,N) MXU feed: contract x dim 1 with W^T dim 0.
    acc_ref[...] += jax.lax.dot_general(
        x_ref[...], w,
        dimension_numbers=(((1,), (0,)), ((), ())),
        preferred_element_type=jnp.float32,
    )

    @pl.when(k == n_k - 1)
    def _finalize():
        acc = acc_ref[...]
        if training and p > 0.0:
            acc = acc * (1.0 / (1.0 - p))           # scale before bias add
        o_ref[...] = (acc + b_ref[...].astype(jnp.float32)).astype(o_ref.dtype)


def weight_drop_linear(x, w_raw, b, *, dropout=0.5, seed=0, training=True,
                       tn=None, tk=None, compute_dtype=None):
    """WeightDrop(nn.Linear)(x): y = x @ dropout(W_raw, p).T + b.

    x:     (B, in_f)
    w_raw: (out_f, in_f)   (PyTorch nn.Linear convention)
    b:     (out_f,)
    """
    B, in_f = x.shape
    out_f, in_f2 = w_raw.shape
    assert in_f == in_f2
    assert 0.0 <= dropout < 1.0

    out_dtype = x.dtype
    if compute_dtype is not None:
        # Optional bf16 operand path (v6e/v7x, bandwidth-bound shapes); accumulator
        # and 1/(1-p) scale stay in f32.
        x = x.astype(compute_dtype)
        w_raw = w_raw.astype(compute_dtype)

    # --- one-time, wrapper-side layout plumbing -------------------------------
    wt = w_raw.T                                     # (in_f, out_f): plain (M,K)x(K,N)
    if tn is None:
        tn = min(256, _round_up(out_f, 128))         # lane-dense output tile
    if tk is None:
        tk = min(512, _round_up(in_f, 128))
    in_f_p = _round_up(in_f, tk)
    out_f_p = _round_up(out_f, tn)
    sub = 16 if x.dtype == jnp.bfloat16 else 8
    B_p = _round_up(B, sub)                          # B stays un-tiled (tiny in RNN use)

    x_p = jnp.zeros((B_p, in_f_p), x.dtype).at[:B, :in_f].set(x)
    wt_p = jnp.zeros((in_f_p, out_f_p), wt.dtype).at[:in_f, :out_f].set(wt)
    b_p = jnp.zeros((1, out_f_p), jnp.float32).at[0, :out_f].set(b.astype(jnp.float32))
    seed_arr = jnp.asarray([seed], dtype=jnp.int32)

    grid = (out_f_p // tn, in_f_p // tk)             # (n parallel, k reduction)

    kernel = partial(_weightdrop_linear_kernel, p=float(dropout),
                     training=bool(training), tk=tk, tn=tn)

    flops = 2 * B_p * in_f_p * out_f_p
    bytes_accessed = (x_p.size * x_p.dtype.itemsize
                      + wt_p.size * wt_p.dtype.itemsize
                      + b_p.size * 4
                      + B_p * out_f_p * jnp.dtype(out_dtype).itemsize)

    y_p = pl.pallas_call(
        kernel,
        out_shape=jax.ShapeDtypeStruct((B_p, out_f_p), out_dtype),
        grid_spec=pltpu.PrefetchScalarGridSpec(
            num_scalar_prefetch=1,                   # seed lands in SMEM before the grid
            grid=grid,
            in_specs=[
                pl.BlockSpec((B_p, tk), lambda n, k, seed: (0, k)),   # x slab (full B)
                pl.BlockSpec((tk, tn), lambda n, k, seed: (k, n)),    # W^T tile
                pl.BlockSpec((1, tn), lambda n, k, seed: (0, n)),     # bias tile
            ],
            out_specs=pl.BlockSpec((B_p, tn), lambda n, k, seed: (0, n)),
            scratch_shapes=[pltpu.VMEM((B_p, tn), jnp.float32)],      # f32 accumulator
        ),
        compiler_params=pltpu.CompilerParams(
            dimension_semantics=("parallel", "arbitrary"),
            vmem_limit_bytes=48 * 1024 * 1024,       # headroom vs v7x's 64 MiB physical
        ),
        cost_estimate=pl.CostEstimate(flops=flops, transcendentals=0,
                                      bytes_accessed=bytes_accessed),
    )(seed_arr, x_p, wt_p, b_p)

    return y_p[:B, :out_f]


if __name__ == "__main__":
    key = jax.random.PRNGKey(0)
    k_x, k_w, k_b = jax.random.split(key, 3)

    # Small but multi-tile shapes: with tn=tk=128 the grid is (2, 2), exercising
    # both the parallel n axis and the k-reduction accumulator path.
    B, in_f, out_f = 8, 256, 256
    p, seed = 0.5, 42
    x = jax.random.normal(k_x, (B, in_f), dtype=jnp.float32)
    w_raw = jax.random.normal(k_w, (out_f, in_f), dtype=jnp.float32) * 0.1
    b = jax.random.normal(k_b, (out_f,), dtype=jnp.float32) * 0.1

    # --- eval mode: dropout is identity -> must match plain linear ------------
    y_eval = weight_drop_linear(x, w_raw, b, dropout=p, seed=seed, training=False,
                                tn=128, tk=128)
    y_eval = jax.block_until_ready(y_eval)
    y_ref_eval = x @ w_raw.T + b
    assert jnp.allclose(y_eval, y_ref_eval, atol=2e-3, rtol=2e-3), "eval-mode mismatch"

    # --- training mode: weight dropout active ----------------------------------
    y_train = weight_drop_linear(x, w_raw, b, dropout=p, seed=seed, training=True,
                                 tn=128, tk=128)
    y_train = jax.block_until_ready(y_train)
    assert y_train.shape == (B, out_f) and bool(jnp.all(jnp.isfinite(y_train)))

    # Host-side reproduction of the in-kernel mask (same stateless hash) for a
    # full numerical check of the training path.
    rows = jnp.arange(in_f, dtype=jnp.uint32)[:, None]     # W^T rows = in_f
    cols = jnp.arange(out_f, dtype=jnp.uint32)[None, :]    # W^T cols = out_f
    bits = _mask_bits(rows, cols, jnp.uint32(seed))
    keep = bits >= jnp.uint32(int(p * 4294967296.0))
    w_kept_t = jnp.where(keep, w_raw.T, 0.0)               # (in_f, out_f)
    y_ref_train = (x @ w_kept_t) / (1.0 - p) + b
    assert jnp.allclose(y_train, y_ref_train, atol=2e-3, rtol=2e-3), "train-mode mismatch"

    print("KERNEL_OK")
</pallas_src>

<mosaic_0001>
module attributes {stable_mosaic.version = 11 : i64} {
  func.func @_weightdrop_linear_kernel(%arg0: i32, %arg1: i32, %arg2: memref<1xi32, #tpu.memory_space<smem>>, %arg3: memref<8x128xf32, #tpu.memory_space<vmem>>, %arg4: memref<128x128xf32, #tpu.memory_space<vmem>>, %arg5: memref<1x128xf32, #tpu.memory_space<vmem>>, %arg6: memref<8x128xf32, #tpu.memory_space<vmem>>, %arg7: memref<8x128xf32, #tpu.memory_space<vmem>>) attributes {dimension_semantics = [#tpu.dimension_semantics<parallel>, #tpu.dimension_semantics<arbitrary>], iteration_bounds = array<i64: 2, 2>, scalar_prefetch = 1 : i64, scratch_operands = 1 : i64, tpu.core_type = #tpu.core_type<tc>, window_params = [{transform_indices = @transform_0, window_bounds = array<i64: 8, 128>}, {transform_indices = @transform_1, window_bounds = array<i64: 128, 128>}, {transform_indices = @transform_2, window_bounds = array<i64: 1, 128>}, {transform_indices = @transform_3, window_bounds = array<i64: 8, 128>}]} {
    %c0_i32 = arith.constant 0 : i32
    %0 = arith.cmpi eq, %arg1, %c0_i32 : i32
    %1 = arith.extui %0 : i1 to i32
    %c0_i32_0 = arith.constant 0 : i32
    %2 = arith.cmpi ne, %1, %c0_i32_0 : i32
    scf.if %2 {
      %cst_9 = arith.constant 0.000000e+00 : f32
      %12 = vector.broadcast %cst_9 : f32 to vector<8x128xf32>
      %c0_10 = arith.constant 0 : index
      %c0_11 = arith.constant 0 : index
      %13 = vector.load %arg7[%c0_10, %c0_11] : memref<8x128xf32, #tpu.memory_space<vmem>>, vector<8x128xf32>
      tpu.vector_store %arg7[%c0_10, %c0_11], %12 {strides = array<i32>} : memref<8x128xf32, #tpu.memory_space<vmem>>, vector<8x128xf32>,
    } else {
    }
    %c0 = arith.constant 0 : index
    %c0_1 = arith.constant 0 : index
    %3 = vector.load %arg4[%c0, %c0_1] : memref<128x128xf32, #tpu.memory_space<vmem>>, vector<128x128xf32>
    %c0_2 = arith.constant 0 : index
    %c0_3 = arith.constant 0 : index
    %4 = vector.load %arg7[%c0_2, %c0_3] : memref<8x128xf32, #tpu.memory_space<vmem>>, vector<8x128xf32>
    %c0_4 = arith.constant 0 : index
    %c0_5 = arith.constant 0 : index
    %5 = vector.load %arg3[%c0_4, %c0_5] : memref<8x128xf32, #tpu.memory_space<vmem>>, vector<8x128xf32>
    %cst = arith.constant dense<0.000000e+00> : vector<8x128xf32>
    %6 = tpu.matmul %5, %3, %cst {dimension_numbers = #tpu.dot_dimension_numbers<[1], [0], [0], [1], [0, 0, 1, 1], [], []>} : vector<8x128xf32>, vector<128x128xf32>, vector<8x128xf32> -> vector<8x128xf32>
    %7 = arith.addf %4, %6 : vector<8x128xf32>
    %c0_6 = arith.constant 0 : index
    %c0_7 = arith.constant 0 : index
    %8 = vector.load %arg7[%c0_6, %c0_7] : memref<8x128xf32, #tpu.memory_space<vmem>>, vector<8x128xf32>
    tpu.vector_store %arg7[%c0_6, %c0_7], %7 {strides = array<i32>} : memref<8x128xf32, #tpu.memory_space<vmem>>, vector<8x128xf32>,
    %c1_i32 = arith.constant 1 : i32
    %9 = arith.cmpi eq, %arg1, %c1_i32 : i32
    %10 = arith.extui %9 : i1 to i32
    %c0_i32_8 = arith.constant 0 : i32
    %11 = arith.cmpi ne, %10, %c0_i32_8 : i32
    scf.if %11 {
      %c0_9 = arith.constant 0 : index
      %c0_10 = arith.constant 0 : index
      %12 = vector.load %arg7[%c0_9, %c0_10] : memref<8x128xf32, #tpu.memory_space<vmem>>, vector<8x128xf32>
      %c0_11 = arith.constant 0 : index
      %c0_12 = arith.constant 0 : index
      %13 = vector.load %arg5[%c0_11, %c0_12] : memref<1x128xf32, #tpu.memory_space<vmem>>, vector<1x128xf32>
      %14 = vector.broadcast %13 : vector<1x128xf32> to vector<8x128xf32>
      %15 = arith.addf %12, %14 : vector<8x128xf32>
      %c0_13 = arith.constant 0 : index
      %c0_14 = arith.constant 0 : index
      %16 = vector.load %arg6[%c0_13, %c0_14] : memref<8x128xf32, #tpu.memory_space<vmem>>, vector<8x128xf32>
      tpu.vector_store %arg6[%c0_13, %c0_14], %15 {strides = array<i32>} : memref<8x128xf32, #tpu.memory_space<vmem>>, vector<8x128xf32>,
    } else {
    }
    return
  }
  func.func @transform_0(%arg0: i32, %arg1: i32, %arg2: memref<1xi32, #tpu.memory_space<smem>>) -> (i32, i32) {
    %c0_i32 = arith.constant 0 : i32
    %c0_i32_0 = arith.constant 0 : i32
    return %c0_i32, %arg1 : i32, i32
  }
  func.func @transform_1(%arg0: i32, %arg1: i32, %arg2: memref<1xi32, #tpu.memory_space<smem>>) -> (i32, i32) {
    %c0_i32 = arith.constant 0 : i32
    return %arg1, %arg0 : i32, i32
  }
  func.func @transform_2(%arg0: i32, %arg1: i32, %arg2: memref<1xi32, #tpu.memory_space<smem>>) -> (i32, i32) {
    %c0_i32 = arith.constant 0 : i32
    %c0_i32_0 = arith.constant 0 : i32
    return %c0_i32, %arg0 : i32, i32
  }
  func.func @transform_3(%arg0: i32, %arg1: i32, %arg2: memref<1xi32, #tpu.memory_space<smem>>) -> (i32, i32) {
    %c0_i32 = arith.constant 0 : i32
    %c0_i32_0 = arith.constant 0 : i32
    return %c0_i32, %arg0 : i32, i32
  }
}

</mosaic_0001>

<bundles_post_ra>
// kernel: tpu_custom_call.1
= control target key start
LH: loop header
LB: loop body
LE: loop exit
PB: predicated region body
PF: predicated region fallthrough
CT: control target
= control target key end

     0   :  { %s1359_s0 = inlined_call_operand.<no memory space> [shape: s32[1], index: 0, kind: input, shape index: {}]   ;;  %s1360_s1 = inlined_call_operand.hbm [shape: f32[8,256], index: 1, kind: input, shape index: {}]   ;;  %s1361_s2 = inlined_call_operand.hbm [shape: f32[256,256], index: 2, kind: input, shape index: {}]   ;;  %s1362_s3 = inlined_call_operand.vmem [shape: f32[1,256], index: 3, kind: input, shape index: {}]   ;;  %s1363_s4 = inlined_call_operand.hbm [shape: f32[8,256], index: 4, kind: output, shape index: {}]  }
   0x1   :  { %1371 = sst [smem:[#allocation21_spill]] %s1360_s1 }
   0x2   :  { %10 = vsyncpa [#allocation6], 0 }
   0x3   :  { %12 = vsyncpa [#allocation6 + $0x1], 0 }
   0x4   :  { %13 = vsyncpa [#allocation9], 0 }
   0x5   :  { %15 = vsyncpa [#allocation9 + $0x1], 0 }
   0x6   :  { %16 = vsyncpa [#allocation7], 0 }
   0x7   :  { %18 = vsyncpa [#allocation7 + $0x1], 0  ;;  %s980_s15 = smov 0   ;;  %s982_s0 = smov 0  }
   0x8   :  { %s984_s16 = smov 0   ;;  %s986_s17 = smov 0  }
   0x9   :  { %s988_s18 = smov 0   ;;  %s990_s19 = smov 0  }
   0xa   :  { %s992_s20 = smov 0   ;;  %s994_s21 = smov 0  }
   0xb   :  { %s996_s22 = smov 0   ;;  %s998_s23 = smov 0  }
   0xc   :  { %s1000_s24 = smov 0   ;;  %s1002_s25 = smov 0  }
   0xd   :  { %s1004_s26 = smov 0   ;;  %s1006_s27 = smov 0  }
   0xe LB: > { %1372 = sst [smem:[#allocation14_spill]] %s923_s22  ;;  %s497_s28 = sadd.s32 4294967295, %s943_s27   ;;  %s943_s27 = sphi %s1006_s27, %s24_s27   ;;  %s939_s26 = sphi %s1004_s26, %s1404_s26   ;;  %s935_s25 = sphi %s1002_s25, %s1416_s25   ;;  %s931_s24 = sphi %s1000_s24, %s1402_s24   ;;  %s927_s23 = sphi %s998_s23, %s1415_s23   ;;  %s923_s22 = sphi %s996_s22, %s1414_s22   ;;  %s919_s21 = sphi %s994_s21, %s1413_s21   ;;  %s915_s20 = sphi %s992_s20, %s1412_s20   ;;  %s911_s19 = sphi %s990_s19, %s1411_s19   ;;  %s907_s18 = sphi %s988_s18, %s1410_s18   ;;  %s903_s17 = sphi %s986_s17, %s1409_s17   ;;  %s899_s16 = sphi %s984_s16, %s1408_s16   ;;  %s895_s0 = sphi %s982_s0, %s1407_s0   ;;  %s891_s15 = sphi %s980_s15, %s1406_s15  }
   0xf   : > { %1373 = sst [smem:[#allocation15_spill]] %s939_s26  ;;  %s33_s30 = sadd.s32 1, %s935_s25 }
  0x10   : > { %s36_s5 = sadd.s32 1, %s939_s26  ;;  %p34_p0 = scmp.ge.s32.totalorder %s33_s30, 2 }
  0x11   : > { %s43_s6 = sadd.s32 1, %s923_s22  ;;  %p50_p1 = scmp.ne.s32.totalorder %s923_s22, %s919_s21 }
  0x12   : > { %p51_p2 = scmp.eq.s32.totalorder %s943_s27, 0  ;;  %s1418_s30 = smov (%p34_p0, %s33_s30), 0 }
  0x13   : > { %1374 = sst [smem:[#allocation16_spill]] %s1418_s30  ;;  %s1420_s5 = smov (!%p34_p0, %s36_s5), %s939_s26 }
  0x14   : > { %s40_s7 = ssub.s32 %s935_s25, %s1418_s30  ;;  %p1063_p3 = por %p51_p2, %p50_p1 }
  0x15   : > { %p38_p4 = scmp.ge.s32.totalorder %s1420_s5, 2  ;;  %p41_p5 = scmp.eq.s32.totalorder %s40_s7, 0 }
  0x16   : > { %p56_p6 = scmp.ne.s32.totalorder %s919_s21, %s915_s20  ;;  %p1070_p7 = scmp.eq.s32.totalorder %s497_s28, 0 }
  0x17   : > { %s1422_s5 = smov (%p38_p4, %s1420_s5), 0  ;;  %s71_s14 = sadd.s32 1, %s911_s19 }
  0x18   : > { %1377 = sst [smem:[#allocation17_spill]] %s1422_s5  ;;  %p1081_p8 = por %p1070_p7, %p56_p6 }
  0x19   : > { %s1077_s10 = scalar_select %p41_p5, %s923_s22, %s43_s6  }
  0x1a   : > { %s1379_s11 = scalar_select %p1081_p8, 1, 0 }
  0x1b   : > { %1378 = sst [smem:[#allocation18_spill]] %s1077_s10  ;;  %s67_s12 = ssub.s32 %s939_s26, %s1422_s5 }
  0x1c   : > { %s68_s13 = sor.u32 %s67_s12, %s40_s7  ;;  %p78_p10 = scmp.ne.s32.totalorder %s911_s19, %s907_s18 }
  0x1d   : > { %p69_p9 = scmp.eq.s32.totalorder %s68_s13, 0  ;;  %p84_p11 = scmp.ne.s32.totalorder %s907_s18, %s903_s17 }
  0x1e   : > { %p121_p12 = scmp.eq.s32.totalorder %s67_s12, 0  ;;  %p1097_p13 = por %p78_p10, %p51_p2 }
  0x1f   : > { %s1093_s20 = scalar_select %p69_p9, %s911_s19, %s71_s14  }
  0x20   : > { %p1103_p0 = por %p84_p11, %p1070_p7  ;;  %s123_s7 = sadd.s32 1, %s899_s16 }
  0x21   : > { %1380 = sst [smem:[#allocation19_spill]] %s1093_s20  ;;  %p133_p1 = scmp.ne.s32.totalorder %s899_s16, %s895_s0 }
  0x22   : > { %s1382_s29 = scalar_select %p1103_p0, 1, 0 }
  0x23   : > { %s1111_s13 = scalar_select %p121_p12, %s899_s16, %s123_s7  }
  0x24   : > { %p134_p4 = scmp.eq.s32.totalorder %s497_s28, 3  ;;  %p139_p5 = scmp.ne.s32.totalorder %s895_s0, %s891_s15 }
  0x25   : > { %1383 = sst [smem:[#allocation20_spill]] %s1111_s13  ;;  %s1384_s17 = sadd.s32 4294967294, %s943_s27  }
  0x26   : > { %p140_p2 = scmp.eq.s32.totalorder %s1384_s17, 3  ;;  %p1119_p6 = por %p134_p4, %p133_p1 }
  0x27   : > { %p612_p7 = scmp.lt.s32.totalorder %s943_s27, 4  ;;  %s160_s14 = sand.u32 1, %s923_s22  }
  0x28   : > { %s1385_s12 = scalar_select %p1119_p6, 1, 0 }
  0x29   : > { %p1124_p9 = por %p140_p2, %p139_p5  ;;  %s501_s5 = sshll.u32 %s160_s14, 3 }
  0x2a   : > { %s502_s7 = sshll.u32 %s935_s25, 7  ;;  %s1387_s1 = sld [smem:[#allocation21_spill]] }
  0x2b   : > { %s1386_s9 = scalar_select %p1124_p9, 1, 0 }
  0x2c   : > { %s164_s17 = scalar_lea.vmem [#allocation5], %s501_s5  ;;  %p1139_p10 = pnand %p612_p7, %p1063_p3 }
  0x2d   : > { %s171_s20 = sshll.u32 %s164_s17, 4  ;;  %p1146_p11 = pnand %p612_p7, %p1097_p13  ;;  %s1135_s20 = int_to_ptr.vmem [resolvable:$true] %s171_s20 }
  0x2e   : > { %s161_s10 = scalar_lea.sflag [#allocation6], %s160_s14  ;;  %p735_p4 = pneg %p1139_p10 }
  0x30   : > { %s1133_s28 = scalar_lea.hbm %s1387_s1, %s502_s7  ;;  %s738_s17 = scalar_lea.hbm %s1387_s1, 256 }
  0x31   : > { %s733_s5 = scalar_lea.hbm %s1133_s28, 128  ;;  %p739_p13 = scmp.lt.u32.totalorder %s1133_s28, %s1387_s1 }
  0x32   : > { %p734_p1 = scmp.ne.s32.totalorder %s1133_s28, %s733_s5  ;;  %p740_p2 = scmp.lt.u32.totalorder %s738_s17, %s733_s5 }
  0x33   : > { %p742_p12 = scmp.lt.u32.totalorder %s733_s5, %s1133_s28 }
  0x34   : > { %p736_p3 = pnand %p735_p4, %p734_p1  ;;  %p741_p7 = por %p740_p2, %p739_p13 }
  0x36   : > { %p737_p5 = pneg %p736_p3  ;;  %p743_p9 = por %p742_p12, %p741_p7 }
  0x38   : > { %p744_p6 = pnand %p743_p9, %p737_p5 }
  0x3a   : > { %747 = shalt.err (!%p744_p6)
}
  0x3b   : > { %s748_s14 = scalar_lea.vmem %s1135_s20, 128  ;;  %s945_s8 = smov [#allocation5]  }
  0x3c   : > { %p749_p1 = scmp.ne.s32.totalorder %s1135_s20, %s748_s14  ;;  %s753_s7 = sshll.u32 %s945_s8, 4  ;;  %s754_s7 = int_to_ptr.vmem [resolvable:$false] %s753_s7 }
  0x3d   : > { %s755_s22 = scalar_lea.vmem %s754_s7, 256  ;;  %p756_p8 = scmp.lt.s32.totalorder %s1135_s20, %s754_s7 }
  0x3e   : > { %p751_p3 = pnand %p749_p1, %p735_p4  ;;  %p757_p13 = scmp.lt.s32.totalorder %s755_s22, %s748_s14 }
  0x40   : > { %p752_p0 = pneg %p751_p3  ;;  %p758_p2 = por %p757_p13, %p756_p8 }
  0x42   : > { %p759_p12 = pnand %p758_p2, %p752_p0 }
  0x44   : > { %762 = shalt.err (!%p759_p12)
}
  0x45   : > { %604 = dma.hbm_to_vmem [thread:$0]  (!%p1139_p10), %s1133_s28, 128, %s1135_s20, %s161_s10  }
  0x46   : > { %p205_p6 = scmp.lt.s32.totalorder %s943_s27, 5  ;;  %s178_s5 = sand.u32 1, %s911_s19  }
  0x47   : > { %s1390_s17 = sshll.u32 %s935_s25, 5  ;;  %p1391_p9 = scmp.ge.s32.totalorder %s943_s27, 1 }
  0x48   : > { %s188_s6 = sadd.s32 %s939_s26, %s1390_s17  ;;  %s503_s13 = sshll.u32 %s178_s5, 7 }
  0x49   : > { %p1183_p8 = pnand %p1391_p9, %p205_p6  ;;  %s506_s8 = sshll.u32 %s188_s6, 7 }
  0x4a   : > { %s1190_s1 = scalar_lea.hbm %s1361_s2, %s506_s8  ;;  %s182_s20 = scalar_lea.vmem [#allocation8], %s503_s13 }
  0x4b   : > { %s191_s28 = sshll.u32 %s182_s20, 4  ;;  %s1194_s10 = scalar_lea.sflag [#allocation9], %s178_s5  ;;  %s1192_s28 = int_to_ptr.vmem [resolvable:$true] %s191_s28 }
  0x4c   : > { %s763_s17 = scalar_lea.hbm %s1190_s1, 2048  ;;  %p765_p10 = pneg %p1146_p11 }
  0x4d   : > { %p764_p0 = scmp.ne.s32.totalorder %s1190_s1, %s763_s17  ;;  %s768_s7 = scalar_lea.hbm %s1361_s2, 8192 }
  0x4e   : > { %p769_p7 = scmp.lt.u32.totalorder %s1190_s1, %s1361_s2  ;;  %p770_p1 = scmp.lt.u32.totalorder %s768_s7, %s763_s17 }
  0x4f   : > { %p766_p4 = pnand %p765_p10, %p764_p0  ;;  %p772_p13 = scmp.lt.u32.totalorder %s763_s17, %s1190_s1 }
  0x50   : > { %p771_p3 = por %p770_p1, %p769_p7 }
  0x51   : > { %p767_p5 = pneg %p766_p4 }
  0x52   : > { %p773_p2 = por %p772_p13, %p771_p3 }
  0x54   : > { %p774_p12 = pnand %p773_p2, %p767_p5 }
  0x56   : > { %777 = shalt.err (!%p774_p12)
}
  0x57   : > { %s778_s5 = scalar_lea.vmem %s1192_s28, 2048  ;;  %s946_s13 = smov [#allocation8]  }
  0x58   : > { %p779_p6 = scmp.ne.s32.totalorder %s1192_s28, %s778_s5  ;;  %s783_s20 = sshll.u32 %s946_s13, 4  ;;  %s784_s20 = int_to_ptr.vmem [resolvable:$false] %s783_s20 }
  0x59   : > { %s785_s26 = scalar_lea.vmem %s784_s20, 4096  ;;  %p786_p4 = scmp.lt.s32.totalorder %s1192_s28, %s784_s20 }
  0x5a   : > { %p781_p9 = pnand %p779_p6, %p765_p10  ;;  %p787_p7 = scmp.lt.s32.totalorder %s785_s26, %s778_s5 }
  0x5c   : > { %p782_p0 = pneg %p781_p9  ;;  %p788_p1 = por %p787_p7, %p786_p4 }
  0x5e   : > { %p789_p3 = pnand %p788_p1, %p782_p0 }
  0x60   : > { %792 = shalt.err (!%p789_p3)
}
  0x61   : > { %s947_s17 = smov 256   ;;  %s948_s6 = smov 128  }
  0x62   : > { %s949_s8 = smov 8   ;;  %209 = sbr.rel (%p1183_p8) target bundleno = 404 (0x194), region = 32 }
  0x63   : > { %607 = dma.hbm_to_vmem [thread:$0]  (!%p1146_p11), %s1190_s1, 2048, %s1192_s28, %s1194_s10, %s947_s17, %s948_s6, %s949_s8  }
  0x64   : > { %s211_s7 = sand.u32 (!%p1183_p8), 1, %s919_s21   ;;  %p1393_p10 = scmp.ne.s32.totalorder (!%p1183_p8), %s1379_s11, 0 }
  0x65   : > { %s1225_s22 = sshll.u32 (!%p1183_p8), %s211_s7, 3  ;;  %s212_s5 = scalar_lea.sflag (!%p1183_p8), [#allocation6], %s211_s7 }
  0x66   : > { %s215_s13 = scalar_lea.vmem (!%p1183_p8), [#allocation5], %s1225_s22 }
  0x69   : > { %878 = dma.done.wait (%p1393_p10), %s212_s5, 128  }
  0x6a   : > { %880 = vsyncadd (%p1393_p10), %s212_s5, 4294967168  ;;  %s220_s30 = sand.u32 1, %s907_s18   ;;  %p1394_p11 = scmp.ne.s32.totalorder %s1382_s29, 0 }
  0x6b   : > { %s509_s1 = sshll.u32 %s220_s30, 7  ;;  %s221_s28 = scalar_lea.sflag [#allocation9], %s220_s30 }
  0x6c   : > { %s1233_s14 = scalar_lea.vmem [#allocation8], %s509_s1 }
  0x6d   : > { %882 = dma.done.wait (%p1394_p11), %s221_s28, 2048  }
  0x6e   : > { %884 = vsyncadd (%p1394_p11), %s221_s28, 4294965248  ;;  %s252_s10 = sand.u32 1, %s895_s0   ;;  %p256_p8 = scmp.lt.s32.totalorder %s931_s24, 1 }
  0x6f   : > { %s1243_s11 = sshll.u32 %s252_s10, 3  ;;  %p511_p5 = scmp.ne.s32.totalorder %s927_s23, 0 }
  0x70   : > { %s1246_s20 = scalar_select %p256_p8, %s931_s24, 1 }
  0x71   : > { %s254_s8 = scalar_lea.vmem [#allocation10], %s1243_s11  ;;  %262 = sbr.rel (%p511_p5) target bundleno = 120 (0x78), region = 44  ;;  %v950_v0 = vmov (!%p511_p5), 0.0  }
  0x72   : > { %s258_s6 = scalar_lea.vmem %s1362_s3, %s1246_s20  ;;  %263 = vst [vmem:[#allocation2] sm:$0xff] (!%p511_p5), %v950_v0 }
  0x78 PF: > { %v264_v1 = vld [vmem:[%s1233_s14] sm:$0xff]  ;;  %v265_v2 = vld [vmem:[%s1233_s14 + $0x8] sm:$0xff]  ;;  %v266_v3 = vld [vmem:[%s1233_s14 + $0x10] sm:$0xff]  ;;  %v951_v4 = vmov 0.0|0.0   ;;  %vm952_vm0 = vmmov 0   ;;  %v953_v7 = vmov 0.0  }
  0x79   : > { %571 = vmatprep.subr.bf16.mxu0 %v951_v4  ;;  %v572_v5 = vpack.c.bf16 %v265_v2, %v264_v1  ;;  %v267_v6 = vld [vmem:[%s1233_s14 + $0x18] sm:$0xff]  ;;  %568 = vmatprep.mubr.msk.f32.mxu0 %vm952_vm0, %v953_v7  ;;  %v268_v9 = vld [vmem:[%s1233_s14 + $0x20] sm:$0xff]  ;;  %v269_v10 = vld [vmem:[%s1233_s14 + $0x28] sm:$0xff]  ;;  %p512_p13 = scmp.ne.s32.totalorder %s927_s23, 1 }
  0x7a   : > { %v575_v8 = vpack.c.bf16 %v267_v6, %v266_v3  ;;  %v578_v11 = vpack.c.bf16 %v269_v10, %v268_v9  ;;  %v270_v12 = vld [vmem:[%s1233_s14 + $0x30] sm:$0xff]  ;;  %v271_v13 = vld [vmem:[%s1233_s14 + $0x38] sm:$0xff]  ;;  %v272_v15 = vld [vmem:[%s1233_s14 + $0x40] sm:$0xff] }
  0x7b   : > { %573 = vmatpush3.bf16.msra.mxu0 %v572_v5  ;;  %v581_v14 = vpack.c.bf16 %v271_v13, %v270_v12  ;;  %v273_v16 = vld [vmem:[%s1233_s14 + $0x48] sm:$0xff]  ;;  %v274_v18 = vld [vmem:[%s1233_s14 + $0x50] sm:$0xff]  ;;  %v275_v19 = vld [vmem:[%s1233_s14 + $0x58] sm:$0xff] }
  0x7c   : > { %574 = vmatprep.subr.bf16.mxu0 %v951_v4  ;;  %v584_v17 = vpack.c.bf16 %v273_v16, %v272_v15  ;;  %v587_v20 = vpack.c.bf16 %v275_v19, %v274_v18  ;;  %v276_v21 = vld [vmem:[%s1233_s14 + $0x60] sm:$0xff]  ;;  %v277_v22 = vld [vmem:[%s1233_s14 + $0x68] sm:$0xff]  ;;  %v278_v24 = vld [vmem:[%s1233_s14 + $0x70] sm:$0xff] }
  0x7d   : > { %v590_v23 = vpack.c.bf16 %v277_v22, %v276_v21  ;;  %v279_v25 = vld [vmem:[%s1233_s14 + $0x78] sm:$0xff]  ;;  %v280_v28 = vld [vmem:[#allocation2] sm:$0xff] }
  0x7e   : > { %v593_v26 = vpack.c.bf16 %v279_v25, %v278_v24  ;;  %v281_v27 = vld [vmem:[%s215_s13] sm:$0xff]  ;;  %v513_v33 = vld [vmem:[%s258_s6] ss:$0 sm:$0xff] (!%p512_p13) }
  0x7f   : > { %576 = vmatpush3.bf16.msra.mxu0 %v575_v8 }
  0x80   : > { %577 = vmatprep.subr.bf16.mxu0 %v951_v4 }
  0x83   : > { %579 = vmatpush3.bf16.msra.mxu0 %v578_v11 }
  0x84   : > { %580 = vmatprep.subr.bf16.mxu0 %v951_v4 }
  0x87   : > { %582 = vmatpush3.bf16.msra.mxu0 %v581_v14 }
  0x88   : > { %583 = vmatprep.subr.bf16.mxu0 %v951_v4 }
  0x8b   : > { %585 = vmatpush3.bf16.msra.mxu0 %v584_v17 }
  0x8c   : > { %586 = vmatprep.subr.bf16.mxu0 %v951_v4 }
  0x8f   : > { %588 = vmatpush3.bf16.msra.mxu0 %v587_v20 }
  0x90   : > { %589 = vmatprep.subr.bf16.mxu0 %v951_v4 }
  0x93   : > { %591 = vmatpush3.bf16.msra.mxu0 %v590_v23 }
  0x94   : > { %592 = vmatprep.subr.bf16.mxu0 %v951_v4 }
  0x97   : > { %594 = vmatpush3.bf16.msra.mxu0 %v593_v26 }
  0x9a   : > { %569 = vmatmul.mubr.f32.vlgmr.msra.gmra.mrb[0].mxu0 %v281_v27 }
 0x16a   : > { %357 = sbr.rel (%p512_p13) target bundleno = 379 (0x17b), region = 48 }
 0x16d   : > { %v348_v29 = vpop.f32.mrb[0].mxu0 }
 0x16e   : > { %v352_v30 = vadd.f32 %v348_v29, %v280_v28  ;;  %v570_v31 = vpop.f32.mrb[1].mxu0 }
 0x170   : > { %353 = vst [vmem:[#allocation2] sm:$0xff] %v352_v30 }
 0x177   : > { %v358_v32 = vld [vmem:[#allocation2] sm:$0xff] }
 0x178   : > { %v366_v34 = vadd.f32 %v513_v33, %v358_v32 }
 0x17a   : > { %367 = vst [vmem:[%s254_s8] sm:$0xff] %v366_v34 }
 0x17b PF: > { %s515_s22 = sshll.u32 %s931_s24, 7  ;;  %s382_s30 = sshll.u32 %s254_s8, 4  ;;  %s383_s30 = int_to_ptr.vmem [resolvable:$true] %s382_s30 }
 0x17c   : > { %s1284_s13 = scalar_lea.hbm %s1363_s4, %s515_s22  ;;  %s369_s1 = scalar_lea.sflag [#allocation7], %s252_s10 }
 0x17d   : > { %s793_s28 = scalar_lea.vmem %s383_s30, 128  ;;  %p1395_p12 = scmp.ne.s32.totalorder %s1385_s12, 0 }
 0x17e   : > { %p794_p2 = scmp.ne.s32.totalorder %s383_s30, %s793_s28  ;;  %s954_s14 = smov [#allocation10]  }
 0x17f   : > { %s797_s20 = sshll.u32 %s954_s14, 4  ;;  %s798_s20 = int_to_ptr.vmem [resolvable:$false] %s797_s20 }
 0x180   : > { %p795_p6 = pnand %p794_p2, %p1395_p12  ;;  %s799_s26 = scalar_lea.vmem %s798_s20, 256 }
 0x181   : > { %p800_p0 = scmp.lt.s32.totalorder %s383_s30, %s798_s20  ;;  %p801_p4 = scmp.lt.s32.totalorder %s799_s26, %s793_s28 }
 0x182   : > { %p796_p9 = pneg %p795_p6 }
 0x183   : > { %p802_p7 = por %p801_p4, %p800_p0 }
 0x185   : > { %p803_p1 = pnand %p802_p7, %p796_p9 }
 0x187   : > { %806 = shalt.err (!%p803_p1)
}
 0x188   : > { %s807_s24 = scalar_lea.hbm %s1284_s13, 128  ;;  %s811_s17 = scalar_lea.hbm %s1363_s4, 256 }
 0x189   : > { %p808_p3 = scmp.ne.s32.totalorder %s1284_s13, %s807_s24  ;;  %p812_p8 = scmp.lt.u32.totalorder %s1284_s13, %s1363_s4 }
 0x18a   : > { %p813_p5 = scmp.lt.u32.totalorder %s811_s17, %s807_s24  ;;  %p815_p2 = scmp.lt.u32.totalorder %s807_s24, %s1284_s13 }
 0x18b   : > { %p809_p10 = pnand %p808_p3, %p1395_p12 }
 0x18c   : > { %p814_p13 = por %p813_p5, %p812_p8 }
 0x18d   : > { %p810_p11 = pneg %p809_p10 }
 0x18e   : > { %p816_p6 = por %p815_p2, %p814_p13 }
 0x190   : > { %p817_p9 = pnand %p816_p6, %p810_p11 }
 0x192   : > { %820 = shalt.err (!%p817_p9)
}
 0x193   : > { %599 = dma.vmem_to_hbm [thread:$0]  (%p1395_p12), %s383_s30, 128, %s1284_s13, %s369_s1  }
 0x194 PF: > { %p613_p0 = scmp.ge.s32.totalorder %s943_s27, 2  ;;  %s394_s29 = sand.u32 1, %s891_s15  }
 0x195   : > { %p1396_p4 = scmp.ne.s32.totalorder %s1386_s9, 0  ;;  %s395_s7 = scalar_lea.sflag [#allocation7], %s394_s29 }
 0x197   : > { %p609_p7 = pnand %p613_p0, %p1396_p4 }
 0x199   : > { %886 = dma.done.wait (!%p609_p7), %s395_s7, 128  }
 0x19a   : > { %888 = vsyncadd (!%p609_p7), %s395_s7, 4294967168  ;;  %s24_s27 = sadd.s32 1, %s943_s27   ;;  %s1398_s12 = sld [smem:[#allocation20_spill]] }
 0x19b   : > { %p1312_p1 = scmp.ge.s32.totalorder %s24_s27, 6   ;;  %s1399_s5 = sld [smem:[#allocation19_spill]] }
 0x19c   : > { %s1400_s23 = sld [smem:[#allocation14_spill]]  ;;  %s1401_s13 = sld [smem:[#allocation18_spill]] }
 0x19d   : > { %s1402_s24 = sld [smem:[#allocation15_spill]]  ;;  %s1403_s9 = sld [smem:[#allocation16_spill]] }
 0x19e   : > { %s1404_s26 = sld [smem:[#allocation17_spill]]  ;;  %s1406_s15 = smov %s895_s0 }
 0x19f   : > { %s1407_s0 = smov %s899_s16  ;;  %s1409_s17 = smov %s907_s18 }
 0x1a0   : > { %s1408_s16 = smov %s1398_s12  ;;  %s1410_s18 = smov %s911_s19 }
 0x1a1   : > { %s1411_s19 = smov %s1399_s5  ;;  %s1412_s20 = smov %s919_s21 }
 0x1a2   : > { %s1413_s21 = smov %s1400_s23  ;;  %s1414_s22 = smov %s1401_s13 }
 0x1a3   : > { %s1415_s23 = smov %s935_s25  ;;  %s1416_s25 = smov %s1403_s9 }
 0x1a4   :  { %23 = sbr.rel (!%p1312_p1) target bundleno = 14 (0xe), region = 101 }
 0x1ab   :  { %400 = vsyncpa [#allocation6], 1 }
 0x1ac   :  { %402 = vsyncpa [#allocation6 + $0x1], 1 }
 0x1ad   :  { %403 = vsyncpa [#allocation9], 1 }
 0x1ae   :  { %405 = vsyncpa [#allocation9 + $0x1], 1 }
 0x1af   :  { %406 = vsyncpa [#allocation7], 1 }
 0x1b0   :  { %408 = vsyncpa [#allocation7 + $0x1], 1 }

</bundles_post_ra>
